<compile_context>
chip_gen: v5e
topology: v5e:2x2
jax: 0.10.0
libtpu: 0.0.40
codegen_flags: <defaults>
</compile_context>

<pallas_src>
import functools

import jax
import jax.numpy as jnp
from jax.experimental import pallas as pl
from jax.experimental.pallas import tpu as pltpu


# ---------------------------------------------------------------------------
# Deterministic micrograd RNG (same as `RNG(50)` used in pytorch_micrograd.py)
# ---------------------------------------------------------------------------
class RNG:
    def __init__(self, seed):
        self.state = seed

    def random_u32(self):
        self.state ^= (self.state >> 12) & 0xFFFFFFFFFFFFFFFF
        self.state ^= (self.state << 25) & 0xFFFFFFFFFFFFFFFF
        self.state ^= (self.state >> 27) & 0xFFFFFFFFFFFFFFFF
        return ((self.state * 0x2545F4914F6CDD1D) >> 32) & 0xFFFFFFFF

    def random(self):
        return (self.random_u32() >> 8) / 16777216.0

    def uniform(self, a=-1.0, b=1.0):
        return a + (b - a) * self.random()


# ---------------------------------------------------------------------------
# Fused Pallas kernel: y = tanh(x @ W + b)   (MXU matmul + VPU bias + EUP tanh)
# ---------------------------------------------------------------------------
def _fused_linear_kernel(x_ref, w_ref, b_ref, o_ref, *, nonlin: bool):
    # x_ref: (bm, K)   w_ref: (K, Np)   b_ref: (1, Np)   o_ref: (bm, Np)
    acc = jnp.dot(x_ref[...], w_ref[...], preferred_element_type=jnp.float32)
    acc = acc + b_ref[...]                      # broadcast bias row over batch
    if nonlin:
        acc = jnp.tanh(acc)                     # EUP transcendental
    o_ref[...] = acc.astype(o_ref.dtype)


def _round_up(v, m):
    return (v + m - 1) // m * m


def fused_linear(x, w, b, nonlin=True, *, max_block_m=256):
    """y = tanh(x @ w + b).

    x: (M, K) float, w: (K, N) float, b: (N,) float  ->  (M, N) float32.
    One pallas_call for the whole batch/layer; output axis padded lane-dense,
    batch axis tiled over a "parallel" 1-D grid.
    """
    M, K = x.shape
    Kw, N = w.shape
    assert K == Kw, (K, Kw)

    # Batch tile: full (sublane-rounded) batch if small, else fixed 256 rows.
    bm = _round_up(max(M, 1), 8)
    if bm > max_block_m:
        bm = max_block_m
    Mp = _round_up(max(M, 1), bm)     # sublane/tile-aligned batch axis
    Np = _round_up(max(N, 1), 128)    # lane-dense neuron/output axis

    xp = jnp.zeros((Mp, K), jnp.float32).at[:M, :].set(x.astype(jnp.float32))
    wp = jnp.zeros((K, Np), jnp.float32).at[:, :N].set(w.astype(jnp.float32))
    bp = jnp.zeros((1, Np), jnp.float32).at[0, :N].set(
        b.astype(jnp.float32).reshape(N))

    out = pl.pallas_call(
        functools.partial(_fused_linear_kernel, nonlin=nonlin),
        out_shape=jax.ShapeDtypeStruct((Mp, Np), jnp.float32),
        grid=(Mp // bm,),
        in_specs=[
            pl.BlockSpec((bm, K), lambda i: (i, 0)),
            pl.BlockSpec((K, Np), lambda i: (0, 0)),   # weights resident in VMEM
            pl.BlockSpec((1, Np), lambda i: (0, 0)),   # bias resident in VMEM
        ],
        out_specs=pl.BlockSpec((bm, Np), lambda i: (i, 0)),
        compiler_params=pltpu.CompilerParams(
            dimension_semantics=("parallel",)),
    )(xp, wp, bp)
    # TODO(synk): for very large K / N add ("parallel","arbitrary") N/K grid
    # axes with a VMEM f32 accumulator; unnecessary at micrograd scale.
    return out[:M, :N]


def neuron_forward(x, w, b, nonlin=True):
    """Exact micrograd Neuron semantics: x (nin,), w (nin,), b (1,) -> (1,)."""
    y = fused_linear(x.reshape(1, -1), w.reshape(-1, 1), b, nonlin=nonlin)
    return y.reshape(1)


if __name__ == "__main__":
    nin = 32          # hidden=32
    nonlin = True

    # Parameter init, exactly as Neuron.__init__ with RNG(50).
    rng = RNG(50)
    w_host = [rng.uniform(-1, 1) * nin ** -0.5 for _ in range(nin)]
    w = jnp.asarray(w_host, dtype=jnp.float32)              # (nin,)
    b = jnp.zeros((1,), dtype=jnp.float32)                   # (1,)

    # ---- single-sample forward (matches the PyTorch module exactly) --------
    key = jax.random.PRNGKey(0)
    x = jax.random.normal(key, (nin,), dtype=jnp.float32)

    out = neuron_forward(x, w, b, nonlin=nonlin)
    out = jax.block_until_ready(out)

    ref = jnp.sum(w * x) + b
    if nonlin:
        ref = jnp.tanh(ref)
    assert out.shape == (1,)
    assert jnp.allclose(out, ref, atol=1e-5, rtol=1e-5), (out, ref)

    # ---- batched forward through the same fused kernel (amortized call) ----
    key_b = jax.random.PRNGKey(1)
    xs = jax.random.normal(key_b, (8, nin), dtype=jnp.float32)    # batch of 8
    outs = fused_linear(xs, w.reshape(nin, 1), b, nonlin=nonlin)  # (8, 1)
    outs = jax.block_until_ready(outs)

    refs = xs @ w.reshape(nin, 1) + b
    if nonlin:
        refs = jnp.tanh(refs)
    assert outs.shape == (8, 1)
    assert jnp.allclose(outs, refs, atol=1e-5, rtol=1e-5), (outs, refs)

    print("KERNEL_OK")
</pallas_src>

<mosaic_0001>
module attributes {stable_mosaic.version = 11 : i64} {
  func.func @_fused_linear_kernel(%arg0: i32, %arg1: memref<8x32xf32, #tpu.memory_space<vmem>>, %arg2: memref<32x128xf32, #tpu.memory_space<vmem>>, %arg3: memref<1x128xf32, #tpu.memory_space<vmem>>, %arg4: memref<8x128xf32, #tpu.memory_space<vmem>>) attributes {dimension_semantics = [#tpu.dimension_semantics<parallel>], iteration_bounds = array<i64: 1>, scalar_prefetch = 0 : i64, scratch_operands = 0 : i64, tpu.core_type = #tpu.core_type<tc>, window_params = [{transform_indices = @transform_0, window_bounds = array<i64: 8, 32>}, {pipeline_mode = #tpu.pipeline_mode<synchronous>, transform_indices = @transform_1, window_bounds = array<i64: 32, 128>}, {pipeline_mode = #tpu.pipeline_mode<synchronous>, transform_indices = @transform_2, window_bounds = array<i64: 1, 128>}, {transform_indices = @transform_3, window_bounds = array<i64: 8, 128>}]} {
    %c0 = arith.constant 0 : index
    %c0_0 = arith.constant 0 : index
    %0 = vector.load %arg1[%c0, %c0_0] : memref<8x32xf32, #tpu.memory_space<vmem>>, vector<8x32xf32>
    %c0_1 = arith.constant 0 : index
    %c0_2 = arith.constant 0 : index
    %1 = vector.load %arg2[%c0_1, %c0_2] : memref<32x128xf32, #tpu.memory_space<vmem>>, vector<32x128xf32>
    %cst = arith.constant dense<0.000000e+00> : vector<8x128xf32>
    %2 = tpu.matmul %0, %1, %cst {dimension_numbers = #tpu.dot_dimension_numbers<[1], [0], [0], [1], [0, 0, 1, 1], [], []>} : vector<8x32xf32>, vector<32x128xf32>, vector<8x128xf32> -> vector<8x128xf32>
    %c0_3 = arith.constant 0 : index
    %c0_4 = arith.constant 0 : index
    %3 = vector.load %arg3[%c0_3, %c0_4] : memref<1x128xf32, #tpu.memory_space<vmem>>, vector<1x128xf32>
    %4 = vector.broadcast %3 : vector<1x128xf32> to vector<8x128xf32>
    %5 = arith.addf %2, %4 : vector<8x128xf32>
    %6 = math.tanh %5 : vector<8x128xf32>
    %c0_5 = arith.constant 0 : index
    %c0_6 = arith.constant 0 : index
    %7 = vector.load %arg4[%c0_5, %c0_6] : memref<8x128xf32, #tpu.memory_space<vmem>>, vector<8x128xf32>
    tpu.vector_store %arg4[%c0_5, %c0_6], %6 {strides = array<i32>} : memref<8x128xf32, #tpu.memory_space<vmem>>, vector<8x128xf32>,
    return
  }
  func.func @transform_0(%arg0: i32) -> (i32, i32) {
    %c0_i32 = arith.constant 0 : i32
    %c0_i32_0 = arith.constant 0 : i32
    return %arg0, %c0_i32 : i32, i32
  }
  func.func @transform_1(%arg0: i32) -> (i32, i32) {
    %c0_i32 = arith.constant 0 : i32
    %c0_i32_0 = arith.constant 0 : i32
    %c0_i32_1 = arith.constant 0 : i32
    return %c0_i32, %c0_i32_0 : i32, i32
  }
  func.func @transform_2(%arg0: i32) -> (i32, i32) {
    %c0_i32 = arith.constant 0 : i32
    %c0_i32_0 = arith.constant 0 : i32
    %c0_i32_1 = arith.constant 0 : i32
    return %c0_i32, %c0_i32_0 : i32, i32
  }
  func.func @transform_3(%arg0: i32) -> (i32, i32) {
    %c0_i32 = arith.constant 0 : i32
    %c0_i32_0 = arith.constant 0 : i32
    return %arg0, %c0_i32 : i32, i32
  }
}

</mosaic_0001>

<bundles_post_ra>
// kernel: tpu_custom_call.1
= control target key start
LH: loop header
LB: loop body
LE: loop exit
PB: predicated region body
PF: predicated region fallthrough
CT: control target
= control target key end

     0   :  { %8 = vsyncpa [#allocation3], 0  ;;  %s222_s0 = inlined_call_operand.hbm [shape: f32[8,32], index: 0, kind: input, shape index: {}]   ;;  %s223_s1 = inlined_call_operand.hbm [shape: f32[32,128], index: 1, kind: input, shape index: {}]   ;;  %s224_s2 = inlined_call_operand.vmem [shape: f32[1,128], index: 2, kind: input, shape index: {}]   ;;  %s225_s3 = inlined_call_operand.hbm [shape: f32[8,128], index: 3, kind: output, shape index: {}]  }
   0x1   :  { %9 = vsyncpa [#allocation6], 0 }
   0x2   :  { %10 = vsyncpa [#allocation4], 0  ;;  %s16_s14 = sshll.u32 %s222_s0, 4  ;;  %s185_s15 = smov [#allocation2]   ;;  %s17_s14 = int_to_ptr.hbm [resolvable:$true] %s16_s14 }
   0x3   :  { %s18_s16 = sshll.u32 %s185_s15, 4  ;;  %s26_s19 = sshll.u32 %s223_s1, 4  ;;  %s19_s16 = int_to_ptr.vmem [resolvable:$true] %s18_s16  ;;  %s27_s19 = int_to_ptr.hbm [resolvable:$true] %s26_s19 }
   0x4   :  { %21 = dma.hbm_to_vmem [thread:$0]  %s17_s14, 128, %s19_s16, [#allocation3]  }
   0x5   :  { %s186_s20 = smov [#allocation5]   ;;  %s187_s22 = smov 128  }
   0x6   :  { %s28_s21 = sshll.u32 %s186_s20, 4  ;;  %s188_s23 = smov 8   ;;  %s29_s21 = int_to_ptr.vmem [resolvable:$true] %s28_s21 }
   0x7   :  { %34 = dma.hbm_to_vmem [thread:$0]  %s27_s19, 512, %s29_s21, [#allocation6], %s187_s22, %s187_s22, %s188_s23  }
   0x8   :  { %179 = dma.done.wait [#allocation3], 128  }
   0x9   :  { %180 = vsyncadd [#allocation3], 4294967168 }
   0xa   :  { %181 = dma.done.wait [#allocation6], 512  }
   0xb   :  { %182 = vsyncadd [#allocation6], 4294966784  ;;  %v49_v0 = vld [vmem:[#allocation5 + $0x18] sm:$0xff]  ;;  %v48_v1 = vld [vmem:[#allocation5 + $0x10] sm:$0xff]  ;;  %vm54_vm0 = vcmask 261120   ;;  %s189_s24 = smov [#allocation7]  }
   0xc   :  { %70 = vmatpush.msra.mxu0 %v49_v0  ;;  %v47_v2 = vld [vmem:[#allocation5 + $0x8] sm:$0xff]  ;;  %v46_v3 = vld [vmem:[#allocation5] sm:$0xff]  ;;  %v45_v4 = vld [vmem:[#allocation2] sm:$0xff]  ;;  %s85_s25 = sshll.u32 %s189_s24, 4  ;;  %s87_s28 = sshll.u32 %s225_s3, 4  ;;  %s86_s25 = int_to_ptr.vmem [resolvable:$true] %s85_s25  ;;  %s88_s28 = int_to_ptr.hbm [resolvable:$true] %s87_s28 }
   0xd   :  { %v104_v5 = vld [vmem:[%s224_s2] ss:$0 sm:$0xff] }
   0xe   :  { %71 = vmatpush.msra.mxu0 %v48_v1 }
  0x10   :  { %72 = vmatpush.msra.mxu0 %v47_v2 }
  0x12   :  { %73 = vmatpush.msra.mxu0 %v46_v3 }
  0x13   :  { %98 = vmatmul.msk.f32.vlgmr.msra.gmra.mxu0 %vm54_vm0, %v45_v4 }
  0x90   :  { %v75_v6 = vpop.f32.mrf.mxu0 }
  0x91   :  { %v76_v7 = vadd.f32 %v104_v5, %v75_v6 }
  0x93   :  { %105 = vtanh.f32 %v76_v7 }
  0x99   :  { %v106_v8 = vpop.eup %105 }
  0x9a   :  { %79 = vst [vmem:[#allocation7] sm:$0xff] %v106_v8 }
  0x9b   :  { %90 = dma.vmem_to_hbm [thread:$0]  %s86_s25, 128, %s88_s28, [#allocation4]  }
  0x9c   :  { %183 = dma.done.wait [#allocation4], 128  }
  0x9d   :  { %184 = vsyncadd [#allocation4], 4294967168 }
  0x9e   :  { %95 = vsyncpa [#allocation3], 1 }
  0x9f   :  { %96 = vsyncpa [#allocation6], 1 }
  0xa0   :  { %97 = vsyncpa [#allocation4], 1 }

</bundles_post_ra>
